<compile_context>
chip_gen: v5e
topology: v5e:2x2
jax: 0.10.0
libtpu: 0.0.40
codegen_flags: <defaults>
</compile_context>

<pallas_src>
import math

import jax
import jax.numpy as jnp
import numpy as np
from jax.experimental import pallas as pl
from jax.experimental.pallas import tpu as pltpu  # noqa: F401  (TPU backend import)

# ---- model config (small, consistent with the module) ----
B = 2           # batch
T = 8           # sequence length (== block_size)
C = 32          # n_embd
N_HEAD = 4      # n_head
HD = C // N_HEAD
EPS = 1e-5      # nn.LayerNorm default
NEG = -1e30     # additive mask value (finite, avoids -inf arithmetic)


def _layernorm(x, gamma, beta):
    mean = jnp.mean(x, axis=-1, keepdims=True)
    var = jnp.mean((x - mean) ** 2, axis=-1, keepdims=True)
    return (x - mean) * jax.lax.rsqrt(var + EPS) * gamma + beta


def _gelu_tanh(x):
    # matches torch.nn.GELU(approximate='tanh')
    c = math.sqrt(2.0 / math.pi)
    return 0.5 * x * (1.0 + jnp.tanh(c * (x + 0.044715 * x * x * x)))


def block_kernel(x_ref,
                 ln1_g_ref, ln1_b_ref,
                 wq_ref, bq_ref, wk_ref, bk_ref, wv_ref, bv_ref,
                 w_aproj_ref, b_aproj_ref,
                 ln2_g_ref, ln2_b_ref,
                 w_fc_ref, b_fc_ref,
                 w_mproj_ref, b_mproj_ref,
                 tile_cols_ref, tile_rows_ref,
                 hmask_k_ref, hmask_v_ref,
                 attn_bias_ref, blocksum_ref,
                 o_ref):
    # Single invocation: x is the whole problem, (N, C) with N = B*T.
    x = x_ref[...]

    # ---------------- attention branch ----------------
    h = _layernorm(x, ln1_g_ref[...], ln1_b_ref[...])

    # Q/K/V projections (c_attn split at prep time; 1/sqrt(HD) folded into Q).
    q = jnp.dot(h, wq_ref[...], preferred_element_type=jnp.float32) + bq_ref[...]
    k = jnp.dot(h, wk_ref[...], preferred_element_type=jnp.float32) + bk_ref[...]
    v = jnp.dot(h, wv_ref[...], preferred_element_type=jnp.float32) + bv_ref[...]

    # Head-expanded K: k_exp[c, h*N + s] = k[s, c] if channel c belongs to head h else 0.
    # k^T tiled across head blocks via one MXU matmul with a constant 0/1 matrix
    # (lhs-contracting dim 0 avoids an explicit transpose), then head-masked.
    k_rep = jax.lax.dot_general(k, tile_cols_ref[...],
                                (((0,), (0,)), ((), ())),
                                preferred_element_type=jnp.float32)      # (C, H*N)
    k_exp = k_rep * hmask_k_ref[...]

    # All-head, all-batch scores in one (N, H*N) tensor.
    s = jnp.dot(q, k_exp, preferred_element_type=jnp.float32)            # (N, H*N)
    s = s + attn_bias_ref[...]            # additive causal + same-batch mask (0 / -1e30)
    s = s - jnp.max(s, axis=-1, keepdims=True)   # global row max: valid (cancels per block)
    p = jnp.exp(s)
    # Per-head row sums broadcast back via a constant block matrix (MXU),
    # normalization on the EUP via approximate reciprocal.
    denom = jnp.dot(p, blocksum_ref[...], preferred_element_type=jnp.float32)
    p = p * pl.reciprocal(denom, approx=True)

    # Head-expanded V: v_exp[h*N + s, c] = v[s, c] if channel c belongs to head h else 0.
    v_rep = jnp.dot(tile_rows_ref[...], v, preferred_element_type=jnp.float32)  # (H*N, C)
    v_exp = v_rep * hmask_v_ref[...]
    y = jnp.dot(p, v_exp, preferred_element_type=jnp.float32)             # (N, C)

    attn_out = jnp.dot(y, w_aproj_ref[...],
                       preferred_element_type=jnp.float32) + b_aproj_ref[...]
    x1 = x + attn_out

    # ---------------- MLP branch ----------------
    h2 = _layernorm(x1, ln2_g_ref[...], ln2_b_ref[...])
    fc = jnp.dot(h2, w_fc_ref[...], preferred_element_type=jnp.float32) + b_fc_ref[...]
    fc = _gelu_tanh(fc)
    mlp_out = jnp.dot(fc, w_mproj_ref[...],
                      preferred_element_type=jnp.float32) + b_mproj_ref[...]

    o_ref[...] = x1 + mlp_out


def prepare_params(p):
    """One-time weight transform: split c_attn into Q/K/V and fold the
    1/sqrt(head_dim) attention scale into the Q projection (weights + bias)."""
    scale = 1.0 / math.sqrt(HD)
    return {
        "ln1_g": p["ln1_g"], "ln1_b": p["ln1_b"],
        "wq": p["w_attn"][:, 0:C] * scale,
        "bq": p["b_attn"][:, 0:C] * scale,
        "wk": p["w_attn"][:, C:2 * C],
        "bk": p["b_attn"][:, C:2 * C],
        "wv": p["w_attn"][:, 2 * C:3 * C],
        "bv": p["b_attn"][:, 2 * C:3 * C],
        "w_aproj": p["w_aproj"], "b_aproj": p["b_aproj"],
        "ln2_g": p["ln2_g"], "ln2_b": p["ln2_b"],
        "w_fc": p["w_fc"], "b_fc": p["b_fc"],
        "w_mproj": p["w_mproj"], "b_mproj": p["b_mproj"],
    }


def build_constants(batch):
    """Constant 0/1 matrices that let every head and batch element run through
    plain 2-D matmuls inside the kernel (no slicing / concat / reshape)."""
    n = batch * T
    hn = N_HEAD * n
    rb = np.arange(n) // T      # batch index of each flattened row
    rt = np.arange(n) % T       # position within the sequence
    allow = (rb[:, None] == rb[None, :]) & (rt[None, :] <= rt[:, None])
    attn_bias = np.tile(np.where(allow, 0.0, NEG).astype(np.float32), (1, N_HEAD))  # (n, hn)

    eye = np.eye(n, dtype=np.float32)
    tile_cols = np.tile(eye, (1, N_HEAD))                  # (n, hn): tiles k^T across head blocks
    tile_rows = np.tile(eye, (N_HEAD, 1))                  # (hn, n): tiles v across head blocks

    ch_head = np.arange(C) // HD                           # head owning each channel
    col_head = np.arange(hn) // n                          # head owning each score column
    hmask_k = (ch_head[:, None] == col_head[None, :]).astype(np.float32)    # (C, hn)
    hmask_v = np.ascontiguousarray(hmask_k.T)                                # (hn, C)
    blocksum = (col_head[:, None] == col_head[None, :]).astype(np.float32)   # (hn, hn)

    arrs = dict(tile_cols=tile_cols, tile_rows=tile_rows,
                hmask_k=hmask_k, hmask_v=hmask_v,
                attn_bias=attn_bias, blocksum=blocksum)
    return {k: jnp.asarray(v) for k, v in arrs.items()}


def block_forward(x, prepped, consts):
    """x: (B, T, C) float32 -> (B, T, C) float32."""
    b_, t_, c_ = x.shape
    assert (t_, c_) == (T, C)
    n = b_ * t_
    x2 = x.reshape(n, c_)   # fold batch into rows; attention batching handled by attn_bias

    args = [
        x2,
        prepped["ln1_g"], prepped["ln1_b"],
        prepped["wq"], prepped["bq"],
        prepped["wk"], prepped["bk"],
        prepped["wv"], prepped["bv"],
        prepped["w_aproj"], prepped["b_aproj"],
        prepped["ln2_g"], prepped["ln2_b"],
        prepped["w_fc"], prepped["b_fc"],
        prepped["w_mproj"], prepped["b_mproj"],
        consts["tile_cols"], consts["tile_rows"],
        consts["hmask_k"], consts["hmask_v"],
        consts["attn_bias"], consts["blocksum"],
    ]
    # No grid / no BlockSpecs: a single step with every operand resident as a
    # full-array VMEM block (total ~0.15 MiB — fits every generation easily).
    out = pl.pallas_call(
        block_kernel,
        out_shape=jax.ShapeDtypeStruct((n, c_), jnp.float32),
    )(*args)
    return out.reshape(b_, t_, c_)


def init_params(key):
    """Deterministic synthetic weights with the shapes implied by Block.__init__."""
    ks = jax.random.split(key, 8)
    std = 0.02
    return {
        "ln1_g": jnp.ones((1, C), jnp.float32),
        "ln1_b": jnp.zeros((1, C), jnp.float32),
        "ln2_g": jnp.ones((1, C), jnp.float32),
        "ln2_b": jnp.zeros((1, C), jnp.float32),
        "w_attn": std * jax.random.normal(ks[0], (C, 3 * C), jnp.float32),
        "b_attn": std * jax.random.normal(ks[1], (1, 3 * C), jnp.float32),
        "w_aproj": std * jax.random.normal(ks[2], (C, C), jnp.float32),
        "b_aproj": std * jax.random.normal(ks[3], (1, C), jnp.float32),
        "w_fc": std * jax.random.normal(ks[4], (C, 4 * C), jnp.float32),
        "b_fc": std * jax.random.normal(ks[5], (1, 4 * C), jnp.float32),
        "w_mproj": std * jax.random.normal(ks[6], (4 * C, C), jnp.float32),
        "b_mproj": std * jax.random.normal(ks[7], (1, C), jnp.float32),
    }


def block_reference(x, p):
    """Pure-JAX reference replicating the PyTorch Block.forward semantics
    (uses the ORIGINAL, untransformed parameters)."""
    def ln(z, g, b):
        m = jnp.mean(z, -1, keepdims=True)
        v = jnp.mean((z - m) ** 2, -1, keepdims=True)
        return (z - m) / jnp.sqrt(v + EPS) * g[0] + b[0]

    h = ln(x, p["ln1_g"], p["ln1_b"])
    qkv = h @ p["w_attn"] + p["b_attn"][0]
    q, k, v = jnp.split(qkv, 3, axis=-1)
    q = q.reshape(B, T, N_HEAD, HD).transpose(0, 2, 1, 3)
    k = k.reshape(B, T, N_HEAD, HD).transpose(0, 2, 1, 3)
    v = v.reshape(B, T, N_HEAD, HD).transpose(0, 2, 1, 3)
    wei = (q @ k.transpose(0, 1, 3, 2)) / math.sqrt(HD)
    mask = jnp.tril(jnp.ones((T, T), bool))
    wei = jnp.where(mask, wei, -jnp.inf)
    wei = jax.nn.softmax(wei, axis=-1)
    y = (wei @ v).transpose(0, 2, 1, 3).reshape(B, T, C)
    x1 = x + (y @ p["w_aproj"] + p["b_aproj"][0])

    h2 = ln(x1, p["ln2_g"], p["ln2_b"])
    fc = _gelu_tanh(h2 @ p["w_fc"] + p["b_fc"][0])
    return x1 + (fc @ p["w_mproj"] + p["b_mproj"][0])


if __name__ == "__main__":
    key = jax.random.PRNGKey(0)
    kx, kp = jax.random.split(key)
    x = jax.random.normal(kx, (B, T, C), jnp.float32)
    params = init_params(kp)

    prepped = prepare_params(params)   # one-time weight transform
    consts = build_constants(B)        # one-time constant mask/tile matrices

    out = block_forward(x, prepped, consts)
    out = jax.block_until_ready(out)

    ref = block_reference(x, params)
    np.testing.assert_allclose(np.asarray(out), np.asarray(ref),
                               rtol=2e-3, atol=2e-3)
    print("KERNEL_OK")
</pallas_src>

<mosaic_0001>
module attributes {stable_mosaic.version = 11 : i64} {
  func.func @block_kernel(%arg0: memref<16x32xf32, #tpu.memory_space<vmem>>, %arg1: memref<1x32xf32, #tpu.memory_space<vmem>>, %arg2: memref<1x32xf32, #tpu.memory_space<vmem>>, %arg3: memref<32x32xf32, #tpu.memory_space<vmem>>, %arg4: memref<1x32xf32, #tpu.memory_space<vmem>>, %arg5: memref<32x32xf32, #tpu.memory_space<vmem>>, %arg6: memref<1x32xf32, #tpu.memory_space<vmem>>, %arg7: memref<32x32xf32, #tpu.memory_space<vmem>>, %arg8: memref<1x32xf32, #tpu.memory_space<vmem>>, %arg9: memref<32x32xf32, #tpu.memory_space<vmem>>, %arg10: memref<1x32xf32, #tpu.memory_space<vmem>>, %arg11: memref<1x32xf32, #tpu.memory_space<vmem>>, %arg12: memref<1x32xf32, #tpu.memory_space<vmem>>, %arg13: memref<32x128xf32, #tpu.memory_space<vmem>>, %arg14: memref<1x128xf32, #tpu.memory_space<vmem>>, %arg15: memref<128x32xf32, #tpu.memory_space<vmem>>, %arg16: memref<1x32xf32, #tpu.memory_space<vmem>>, %arg17: memref<16x64xf32, #tpu.memory_space<vmem>>, %arg18: memref<64x16xf32, #tpu.memory_space<vmem>>, %arg19: memref<32x64xf32, #tpu.memory_space<vmem>>, %arg20: memref<64x32xf32, #tpu.memory_space<vmem>>, %arg21: memref<16x64xf32, #tpu.memory_space<vmem>>, %arg22: memref<64x64xf32, #tpu.memory_space<vmem>>, %arg23: memref<16x32xf32, #tpu.memory_space<vmem>>) attributes {dimension_semantics = [], scalar_prefetch = 0 : i64, scratch_operands = 0 : i64, tpu.core_type = #tpu.core_type<tc>} {
    %c0 = arith.constant 0 : index
    %c0_0 = arith.constant 0 : index
    %0 = vector.load %arg0[%c0, %c0_0] : memref<16x32xf32, #tpu.memory_space<vmem>>, vector<16x32xf32>
    %c0_1 = arith.constant 0 : index
    %c0_2 = arith.constant 0 : index
    %1 = vector.load %arg1[%c0_1, %c0_2] : memref<1x32xf32, #tpu.memory_space<vmem>>, vector<1x32xf32>
    %c0_3 = arith.constant 0 : index
    %c0_4 = arith.constant 0 : index
    %2 = vector.load %arg2[%c0_3, %c0_4] : memref<1x32xf32, #tpu.memory_space<vmem>>, vector<1x32xf32>
    %cst = arith.constant dense<0.000000e+00> : vector<16xf32>
    %3 = vector.multi_reduction <add>, %0, %cst [1] : vector<16x32xf32> to vector<16xf32>
    %4 = vector.shape_cast %3 : vector<16xf32> to vector<16x1xf32>
    %cst_5 = arith.constant 3.200000e+01 : f32
    %5 = vector.broadcast %cst_5 : f32 to vector<16x1xf32>
    %6 = arith.divf %4, %5 : vector<16x1xf32>
    %7 = vector.broadcast %6 : vector<16x1xf32> to vector<16x32xf32>
    %8 = arith.subf %0, %7 : vector<16x32xf32>
    %9 = arith.mulf %8, %8 : vector<16x32xf32>
    %cst_6 = arith.constant dense<0.000000e+00> : vector<16xf32>
    %10 = vector.multi_reduction <add>, %9, %cst_6 [1] : vector<16x32xf32> to vector<16xf32>
    %11 = vector.shape_cast %10 : vector<16xf32> to vector<16x1xf32>
    %cst_7 = arith.constant 3.200000e+01 : f32
    %12 = vector.broadcast %cst_7 : f32 to vector<16x1xf32>
    %13 = arith.divf %11, %12 : vector<16x1xf32>
    %14 = vector.broadcast %6 : vector<16x1xf32> to vector<16x32xf32>
    %15 = arith.subf %0, %14 : vector<16x32xf32>
    %cst_8 = arith.constant 9.99999974E-6 : f32
    %16 = vector.broadcast %cst_8 : f32 to vector<16x1xf32>
    %17 = arith.addf %13, %16 : vector<16x1xf32>
    %18 = math.rsqrt %17 : vector<16x1xf32>
    %19 = vector.broadcast %18 : vector<16x1xf32> to vector<16x32xf32>
    %20 = arith.mulf %15, %19 : vector<16x32xf32>
    %21 = vector.broadcast %1 : vector<1x32xf32> to vector<16x32xf32>
    %22 = arith.mulf %20, %21 : vector<16x32xf32>
    %23 = vector.broadcast %2 : vector<1x32xf32> to vector<16x32xf32>
    %24 = arith.addf %22, %23 : vector<16x32xf32>
    %c0_9 = arith.constant 0 : index
    %c0_10 = arith.constant 0 : index
    %25 = vector.load %arg3[%c0_9, %c0_10] : memref<32x32xf32, #tpu.memory_space<vmem>>, vector<32x32xf32>
    %cst_11 = arith.constant dense<0.000000e+00> : vector<16x32xf32>
    %26 = tpu.matmul %24, %25, %cst_11 {dimension_numbers = #tpu.dot_dimension_numbers<[1], [0], [0], [1], [0, 0, 1, 1], [], []>} : vector<16x32xf32>, vector<32x32xf32>, vector<16x32xf32> -> vector<16x32xf32>
    %c0_12 = arith.constant 0 : index
    %c0_13 = arith.constant 0 : index
    %27 = vector.load %arg4[%c0_12, %c0_13] : memref<1x32xf32, #tpu.memory_space<vmem>>, vector<1x32xf32>
    %28 = vector.broadcast %27 : vector<1x32xf32> to vector<16x32xf32>
    %29 = arith.addf %26, %28 : vector<16x32xf32>
    %c0_14 = arith.constant 0 : index
    %c0_15 = arith.constant 0 : index
    %30 = vector.load %arg5[%c0_14, %c0_15] : memref<32x32xf32, #tpu.memory_space<vmem>>, vector<32x32xf32>
    %cst_16 = arith.constant dense<0.000000e+00> : vector<16x32xf32>
    %31 = tpu.matmul %24, %30, %cst_16 {dimension_numbers = #tpu.dot_dimension_numbers<[1], [0], [0], [1], [0, 0, 1, 1], [], []>} : vector<16x32xf32>, vector<32x32xf32>, vector<16x32xf32> -> vector<16x32xf32>
    %c0_17 = arith.constant 0 : index
    %c0_18 = arith.constant 0 : index
    %32 = vector.load %arg6[%c0_17, %c0_18] : memref<1x32xf32, #tpu.memory_space<vmem>>, vector<1x32xf32>
    %33 = vector.broadcast %32 : vector<1x32xf32> to vector<16x32xf32>
    %34 = arith.addf %31, %33 : vector<16x32xf32>
    %c0_19 = arith.constant 0 : index
    %c0_20 = arith.constant 0 : index
    %35 = vector.load %arg7[%c0_19, %c0_20] : memref<32x32xf32, #tpu.memory_space<vmem>>, vector<32x32xf32>
    %cst_21 = arith.constant dense<0.000000e+00> : vector<16x32xf32>
    %36 = tpu.matmul %24, %35, %cst_21 {dimension_numbers = #tpu.dot_dimension_numbers<[1], [0], [0], [1], [0, 0, 1, 1], [], []>} : vector<16x32xf32>, vector<32x32xf32>, vector<16x32xf32> -> vector<16x32xf32>
    %c0_22 = arith.constant 0 : index
    %c0_23 = arith.constant 0 : index
    %37 = vector.load %arg8[%c0_22, %c0_23] : memref<1x32xf32, #tpu.memory_space<vmem>>, vector<1x32xf32>
    %38 = vector.broadcast %37 : vector<1x32xf32> to vector<16x32xf32>
    %39 = arith.addf %36, %38 : vector<16x32xf32>
    %c0_24 = arith.constant 0 : index
    %c0_25 = arith.constant 0 : index
    %40 = vector.load %arg17[%c0_24, %c0_25] : memref<16x64xf32, #tpu.memory_space<vmem>>, vector<16x64xf32>
    %cst_26 = arith.constant dense<0.000000e+00> : vector<32x64xf32>
    %41 = tpu.matmul %34, %40, %cst_26 {dimension_numbers = #tpu.dot_dimension_numbers<[0], [0], [1], [1], [0, 1, 1, 1], [], []>} : vector<16x32xf32>, vector<16x64xf32>, vector<32x64xf32> -> vector<32x64xf32>
    %c0_27 = arith.constant 0 : index
    %c0_28 = arith.constant 0 : index
    %42 = vector.load %arg19[%c0_27, %c0_28] : memref<32x64xf32, #tpu.memory_space<vmem>>, vector<32x64xf32>
    %43 = arith.mulf %41, %42 : vector<32x64xf32>
    %cst_29 = arith.constant dense<0.000000e+00> : vector<16x64xf32>
    %44 = tpu.matmul %29, %43, %cst_29 {dimension_numbers = #tpu.dot_dimension_numbers<[1], [0], [0], [1], [0, 0, 1, 1], [], []>} : vector<16x32xf32>, vector<32x64xf32>, vector<16x64xf32> -> vector<16x64xf32>
    %c0_30 = arith.constant 0 : index
    %c0_31 = arith.constant 0 : index
    %45 = vector.load %arg21[%c0_30, %c0_31] : memref<16x64xf32, #tpu.memory_space<vmem>>, vector<16x64xf32>
    %46 = arith.addf %44, %45 : vector<16x64xf32>
    %cst_32 = arith.constant dense<0xFF800000> : vector<16xf32>
    %47 = vector.multi_reduction <maximumf>, %46, %cst_32 [1] : vector<16x64xf32> to vector<16xf32>
    %48 = vector.shape_cast %47 : vector<16xf32> to vector<16x1xf32>
    %49 = vector.broadcast %48 : vector<16x1xf32> to vector<16x64xf32>
    %50 = arith.subf %46, %49 : vector<16x64xf32>
    %51 = math.exp %50 : vector<16x64xf32>
    %c0_33 = arith.constant 0 : index
    %c0_34 = arith.constant 0 : index
    %52 = vector.load %arg22[%c0_33, %c0_34] : memref<64x64xf32, #tpu.memory_space<vmem>>, vector<64x64xf32>
    %cst_35 = arith.constant dense<0.000000e+00> : vector<16x64xf32>
    %53 = tpu.matmul %51, %52, %cst_35 {dimension_numbers = #tpu.dot_dimension_numbers<[1], [0], [0], [1], [0, 0, 1, 1], [], []>} : vector<16x64xf32>, vector<64x64xf32>, vector<16x64xf32> -> vector<16x64xf32>
    %54 = tpu.reciprocal %53 {approx = true} : vector<16x64xf32> -> vector<16x64xf32>
    %55 = arith.mulf %51, %54 : vector<16x64xf32>
    %c0_36 = arith.constant 0 : index
    %c0_37 = arith.constant 0 : index
    %56 = vector.load %arg18[%c0_36, %c0_37] : memref<64x16xf32, #tpu.memory_space<vmem>>, vector<64x16xf32>
    %cst_38 = arith.constant dense<0.000000e+00> : vector<64x32xf32>
    %57 = tpu.matmul %56, %39, %cst_38 {dimension_numbers = #tpu.dot_dimension_numbers<[1], [0], [0], [1], [0, 0, 1, 1], [], []>} : vector<64x16xf32>, vector<16x32xf32>, vector<64x32xf32> -> vector<64x32xf32>
    %c0_39 = arith.constant 0 : index
    %c0_40 = arith.constant 0 : index
    %58 = vector.load %arg20[%c0_39, %c0_40] : memref<64x32xf32, #tpu.memory_space<vmem>>, vector<64x32xf32>
    %59 = arith.mulf %57, %58 : vector<64x32xf32>
    %cst_41 = arith.constant dense<0.000000e+00> : vector<16x32xf32>
    %60 = tpu.matmul %55, %59, %cst_41 {dimension_numbers = #tpu.dot_dimension_numbers<[1], [0], [0], [1], [0, 0, 1, 1], [], []>} : vector<16x64xf32>, vector<64x32xf32>, vector<16x32xf32> -> vector<16x32xf32>
    %c0_42 = arith.constant 0 : index
    %c0_43 = arith.constant 0 : index
    %61 = vector.load %arg9[%c0_42, %c0_43] : memref<32x32xf32, #tpu.memory_space<vmem>>, vector<32x32xf32>
    %cst_44 = arith.constant dense<0.000000e+00> : vector<16x32xf32>
    %62 = tpu.matmul %60, %61, %cst_44 {dimension_numbers = #tpu.dot_dimension_numbers<[1], [0], [0], [1], [0, 0, 1, 1], [], []>} : vector<16x32xf32>, vector<32x32xf32>, vector<16x32xf32> -> vector<16x32xf32>
    %c0_45 = arith.constant 0 : index
    %c0_46 = arith.constant 0 : index
    %63 = vector.load %arg10[%c0_45, %c0_46] : memref<1x32xf32, #tpu.memory_space<vmem>>, vector<1x32xf32>
    %64 = vector.broadcast %63 : vector<1x32xf32> to vector<16x32xf32>
    %65 = arith.addf %62, %64 : vector<16x32xf32>
    %66 = arith.addf %0, %65 : vector<16x32xf32>
    %c0_47 = arith.constant 0 : index
    %c0_48 = arith.constant 0 : index
    %67 = vector.load %arg11[%c0_47, %c0_48] : memref<1x32xf32, #tpu.memory_space<vmem>>, vector<1x32xf32>
    %c0_49 = arith.constant 0 : index
    %c0_50 = arith.constant 0 : index
    %68 = vector.load %arg12[%c0_49, %c0_50] : memref<1x32xf32, #tpu.memory_space<vmem>>, vector<1x32xf32>
    %cst_51 = arith.constant dense<0.000000e+00> : vector<16xf32>
    %69 = vector.multi_reduction <add>, %66, %cst_51 [1] : vector<16x32xf32> to vector<16xf32>
    %70 = vector.shape_cast %69 : vector<16xf32> to vector<16x1xf32>
    %cst_52 = arith.constant 3.200000e+01 : f32
    %71 = vector.broadcast %cst_52 : f32 to vector<16x1xf32>
    %72 = arith.divf %70, %71 : vector<16x1xf32>
    %73 = vector.broadcast %72 : vector<16x1xf32> to vector<16x32xf32>
    %74 = arith.subf %66, %73 : vector<16x32xf32>
    %75 = arith.mulf %74, %74 : vector<16x32xf32>
    %cst_53 = arith.constant dense<0.000000e+00> : vector<16xf32>
    %76 = vector.multi_reduction <add>, %75, %cst_53 [1] : vector<16x32xf32> to vector<16xf32>
    %77 = vector.shape_cast %76 : vector<16xf32> to vector<16x1xf32>
    %cst_54 = arith.constant 3.200000e+01 : f32
    %78 = vector.broadcast %cst_54 : f32 to vector<16x1xf32>
    %79 = arith.divf %77, %78 : vector<16x1xf32>
    %80 = vector.broadcast %72 : vector<16x1xf32> to vector<16x32xf32>
    %81 = arith.subf %66, %80 : vector<16x32xf32>
    %cst_55 = arith.constant 9.99999974E-6 : f32
    %82 = vector.broadcast %cst_55 : f32 to vector<16x1xf32>
    %83 = arith.addf %79, %82 : vector<16x1xf32>
    %84 = math.rsqrt %83 : vector<16x1xf32>
    %85 = vector.broadcast %84 : vector<16x1xf32> to vector<16x32xf32>
    %86 = arith.mulf %81, %85 : vector<16x32xf32>
    %87 = vector.broadcast %67 : vector<1x32xf32> to vector<16x32xf32>
    %88 = arith.mulf %86, %87 : vector<16x32xf32>
    %89 = vector.broadcast %68 : vector<1x32xf32> to vector<16x32xf32>
    %90 = arith.addf %88, %89 : vector<16x32xf32>
    %c0_56 = arith.constant 0 : index
    %c0_57 = arith.constant 0 : index
    %91 = vector.load %arg13[%c0_56, %c0_57] : memref<32x128xf32, #tpu.memory_space<vmem>>, vector<32x128xf32>
    %cst_58 = arith.constant dense<0.000000e+00> : vector<16x128xf32>
    %92 = tpu.matmul %90, %91, %cst_58 {dimension_numbers = #tpu.dot_dimension_numbers<[1], [0], [0], [1], [0, 0, 1, 1], [], []>} : vector<16x32xf32>, vector<32x128xf32>, vector<16x128xf32> -> vector<16x128xf32>
    %c0_59 = arith.constant 0 : index
    %c0_60 = arith.constant 0 : index
    %93 = vector.load %arg14[%c0_59, %c0_60] : memref<1x128xf32, #tpu.memory_space<vmem>>, vector<1x128xf32>
    %94 = vector.broadcast %93 : vector<1x128xf32> to vector<16x128xf32>
    %95 = arith.addf %92, %94 : vector<16x128xf32>
    %cst_61 = arith.constant 5.000000e-01 : f32
    %96 = vector.broadcast %cst_61 : f32 to vector<16x128xf32>
    %97 = arith.mulf %96, %95 : vector<16x128xf32>
    %cst_62 = arith.constant 4.471500e-02 : f32
    %98 = vector.broadcast %cst_62 : f32 to vector<16x128xf32>
    %99 = arith.mulf %98, %95 : vector<16x128xf32>
    %100 = arith.mulf %99, %95 : vector<16x128xf32>
    %101 = arith.mulf %100, %95 : vector<16x128xf32>
    %102 = arith.addf %95, %101 : vector<16x128xf32>
    %cst_63 = arith.constant 0.797884583 : f32
    %103 = vector.broadcast %cst_63 : f32 to vector<16x128xf32>
    %104 = arith.mulf %103, %102 : vector<16x128xf32>
    %105 = math.tanh %104 : vector<16x128xf32>
    %cst_64 = arith.constant 1.000000e+00 : f32
    %106 = vector.broadcast %cst_64 : f32 to vector<16x128xf32>
    %107 = arith.addf %106, %105 : vector<16x128xf32>
    %108 = arith.mulf %97, %107 : vector<16x128xf32>
    %c0_65 = arith.constant 0 : index
    %c0_66 = arith.constant 0 : index
    %109 = vector.load %arg15[%c0_65, %c0_66] : memref<128x32xf32, #tpu.memory_space<vmem>>, vector<128x32xf32>
    %cst_67 = arith.constant dense<0.000000e+00> : vector<16x32xf32>
    %110 = tpu.matmul %108, %109, %cst_67 {dimension_numbers = #tpu.dot_dimension_numbers<[1], [0], [0], [1], [0, 0, 1, 1], [], []>} : vector<16x128xf32>, vector<128x32xf32>, vector<16x32xf32> -> vector<16x32xf32>
    %c0_68 = arith.constant 0 : index
    %c0_69 = arith.constant 0 : index
    %111 = vector.load %arg16[%c0_68, %c0_69] : memref<1x32xf32, #tpu.memory_space<vmem>>, vector<1x32xf32>
    %112 = vector.broadcast %111 : vector<1x32xf32> to vector<16x32xf32>
    %113 = arith.addf %110, %112 : vector<16x32xf32>
    %114 = arith.addf %66, %113 : vector<16x32xf32>
    %c0_70 = arith.constant 0 : index
    %c0_71 = arith.constant 0 : index
    %115 = vector.load %arg23[%c0_70, %c0_71] : memref<16x32xf32, #tpu.memory_space<vmem>>, vector<16x32xf32>
    tpu.vector_store %arg23[%c0_70, %c0_71], %114 {strides = array<i32>} : memref<16x32xf32, #tpu.memory_space<vmem>>, vector<16x32xf32>,
    return
  }
}

</mosaic_0001>

<bundles_post_ra>
// kernel: tpu_custom_call.1
= control target key start
LH: loop header
LB: loop body
LE: loop exit
PB: predicated region body
PF: predicated region fallthrough
CT: control target
= control target key end

     0   :  { %s1737_s0 = inlined_call_operand.vmem [shape: f32[16,32], index: 0, kind: input, shape index: {}]   ;;  %s1738_s1 = inlined_call_operand.hbm [shape: f32[1,32], index: 1, kind: input, shape index: {}]   ;;  %s1739_s2 = inlined_call_operand.hbm [shape: f32[1,32], index: 2, kind: input, shape index: {}]   ;;  %s1740_s3 = inlined_call_operand.vmem [shape: f32[32,32], index: 3, kind: input, shape index: {}]   ;;  %s1741_s4 = inlined_call_operand.vmem [shape: f32[1,32], index: 4, kind: input, shape index: {}]   ;;  %s1742_s5 = inlined_call_operand.vmem [shape: f32[32,32], index: 5, kind: input, shape index: {}]   ;;  %s1743_s6 = inlined_call_operand.hbm [shape: f32[1,32], index: 6, kind: input, shape index: {}]   ;;  %s1744_s7 = inlined_call_operand.vmem [shape: f32[32,32], index: 7, kind: input, shape index: {}]   ;;  %s1745_s8 = inlined_call_operand.hbm [shape: f32[1,32], index: 8, kind: input, shape index: {}]   ;;  %s1746_s9 = inlined_call_operand.vmem [shape: f32[32,32], index: 9, kind: input, shape index: {}]   ;;  %s1747_s10 = inlined_call_operand.hbm [shape: f32[1,32], index: 10, kind: input, shape index: {}]   ;;  %s1748_s11 = inlined_call_operand.hbm [shape: f32[1,32], index: 11, kind: input, shape index: {}]   ;;  %s1749_s12 = inlined_call_operand.hbm [shape: f32[1,32], index: 12, kind: input, shape index: {}]   ;;  %s1750_s13 = inlined_call_operand.vmem [shape: f32[32,128], index: 13, kind: input, shape index: {}]   ;;  %s1751_s14 = inlined_call_operand.hbm [shape: f32[1,128], index: 14, kind: input, shape index: {}]   ;;  %s1752_s15 = inlined_call_operand.vmem [shape: f32[128,32], index: 15, kind: input, shape index: {}]   ;;  %s1753_s16 = inlined_call_operand.hbm [shape: f32[1,32], index: 16, kind: input, shape index: {}]   ;;  %s1754_s17 = inlined_call_operand.hbm [shape: f32[16,64], index: 17, kind: input, shape index: {}]   ;;  %s1755_s18 = inlined_call_operand.vmem [shape: f32[64,16], index: 18, kind: input, shape index: {}]   ;;  %s1756_s19 = inlined_call_operand.vmem [shape: f32[32,64], index: 19, kind: input, shape index: {}]   ;;  %s1757_s20 = inlined_call_operand.vmem [shape: f32[64,32], index: 20, kind: input, shape index: {}]   ;;  %s1758_s21 = inlined_call_operand.hbm [shape: f32[16,64], index: 21, kind: input, shape index: {}]   ;;  %s1759_s22 = inlined_call_operand.vmem [shape: f32[64,64], index: 22, kind: input, shape index: {}]   ;;  %s1760_s23 = inlined_call_operand.hbm [shape: f32[16,32], index: 23, kind: output, shape index: {}]  }
   0x1   :  { %1765 = sst [smem:[#allocation28_spill]] %s1737_s0 }
   0x2   :  { %1766 = sst [smem:[#allocation29_spill]] %s1738_s1 }
   0x3   :  { %1767 = sst [smem:[#allocation30_spill]] %s1739_s2 }
   0x4   :  { %1768 = sst [smem:[#allocation31_spill]] %s1740_s3 }
   0x5   :  { %1769 = sst [smem:[#allocation32_spill]] %s1741_s4 }
   0x6   :  { %1770 = sst [smem:[#allocation33_spill]] %s1742_s5 }
   0x7   :  { %1771 = sst [smem:[#allocation34_spill]] %s1743_s6 }
   0x8   :  { %1772 = sst [smem:[#allocation35_spill]] %s1744_s7 }
   0x9   :  { %28 = vsyncpa [#allocation3], 0 }
   0xa   :  { %29 = vsyncpa [#allocation6], 0 }
   0xb   :  { %30 = vsyncpa [#allocation9], 0 }
   0xc   :  { %31 = vsyncpa [#allocation12], 0 }
   0xd   :  { %32 = vsyncpa [#allocation15], 0 }
   0xe   :  { %33 = vsyncpa [#allocation18], 0  ;;  %s1773_s24 = sld [smem:[#allocation30_spill]] }
  0x14   :  { %s53_s25 = sshll.u32 %s1773_s24, 4  ;;  %s54_s25 = int_to_ptr.hbm [resolvable:$true] %s53_s25 }
  0x15   :  { %34 = vsyncpa [#allocation4], 0  ;;  %s1281_s5 = smov [#allocation5]   ;;  %s83_s6 = sshll.u32 %s1745_s8, 4  ;;  %s84_s6 = int_to_ptr.hbm [resolvable:$true] %s83_s6 }
  0x16   :  { %s55_s1 = sshll.u32 %s1281_s5, 4  ;;  %s1282_s27 = smov [#allocation8]   ;;  %s56_s1 = int_to_ptr.vmem [resolvable:$true] %s55_s1 }
  0x17   :  { %58 = dma.hbm_to_vmem [thread:$0]  %s54_s25, 16, %s56_s1, [#allocation6]  }
  0x18   :  { %s85_s7 = sshll.u32 %s1282_s27, 4  ;;  %s107_s3 = sshll.u32 %s1748_s11, 4  ;;  %s86_s7 = int_to_ptr.vmem [resolvable:$true] %s85_s7  ;;  %s108_s3 = int_to_ptr.hbm [resolvable:$true] %s107_s3 }
  0x19   :  { %88 = dma.hbm_to_vmem [thread:$0]  %s84_s6, 16, %s86_s7, [#allocation9]  }
  0x1a   :  { %s131_s30 = sshll.u32 %s1751_s14, 4  ;;  %s1283_s24 = smov [#allocation11]   ;;  %s132_s30 = int_to_ptr.hbm [resolvable:$true] %s131_s30 }
  0x1b   :  { %s109_s5 = sshll.u32 %s1283_s24, 4  ;;  %s1284_s8 = smov [#allocation14]   ;;  %s110_s5 = int_to_ptr.vmem [resolvable:$true] %s109_s5 }
  0x1c   :  { %112 = dma.hbm_to_vmem [thread:$0]  %s108_s3, 16, %s110_s5, [#allocation12]  }
  0x1d   :  { %s133_s25 = sshll.u32 %s1284_s8, 4  ;;  %s154_s2 = sshll.u32 %s1754_s17, 4  ;;  %s134_s25 = int_to_ptr.vmem [resolvable:$true] %s133_s25  ;;  %s155_s2 = int_to_ptr.hbm [resolvable:$true] %s154_s2 }
  0x1e   :  { %136 = dma.hbm_to_vmem [thread:$0]  %s132_s30, 16, %s134_s25, [#allocation15]  }
  0x1f   :  { %s1285_s11 = smov [#allocation17]   ;;  %s1774_s14 = sld [smem:[#allocation29_spill]] }
  0x20   :  { %s156_s6 = sshll.u32 %s1285_s11, 4  ;;  %s1286_s29 = smov 128   ;;  %s157_s6 = int_to_ptr.vmem [resolvable:$true] %s156_s6 }
  0x21   :  { %s1287_s0 = smov 8   ;;  %s1288_s3 = smov [#allocation2]  }
  0x22   :  { %162 = dma.hbm_to_vmem [thread:$0]  %s155_s2, 256, %s157_s6, [#allocation18], %s1286_s29, %s1286_s29, %s1287_s0  }
  0x23   :  { %s44_s4 = sshll.u32 %s1288_s3, 4  ;;  %s1775_s5 = sld [smem:[#allocation34_spill]]  ;;  %s45_s4 = int_to_ptr.vmem [resolvable:$true] %s44_s4 }
  0x24   :  { %s96_s1 = sshll.u32 %s1747_s10, 4  ;;  %s1289_s26 = smov [#allocation7]   ;;  %s97_s1 = int_to_ptr.hbm [resolvable:$true] %s96_s1 }
  0x25   :  { %s42_s28 = sshll.u32 %s1774_s14, 4  ;;  %s72_s11 = sshll.u32 %s1289_s26, 4  ;;  %s43_s28 = int_to_ptr.hbm [resolvable:$true] %s42_s28  ;;  %s73_s11 = int_to_ptr.vmem [resolvable:$true] %s72_s11 }
  0x26   :  { %47 = dma.hbm_to_vmem [thread:$0]  %s43_s28, 16, %s45_s4, [#allocation3]  }
  0x27   :  { %s1290_s2 = smov [#allocation10]   ;;  %s118_s14 = sshll.u32 %s1749_s12, 4  ;;  %s119_s14 = int_to_ptr.hbm [resolvable:$true] %s118_s14 }
  0x28   :  { %s98_s6 = sshll.u32 %s1290_s2, 4  ;;  %s144_s4 = sshll.u32 %s1753_s16, 4  ;;  %s99_s6 = int_to_ptr.vmem [resolvable:$true] %s98_s6  ;;  %s145_s4 = int_to_ptr.hbm [resolvable:$true] %s144_s4 }
  0x29   :  { %s70_s30 = sshll.u32 %s1775_s5, 4  ;;  %s1291_s17 = smov [#allocation13]   ;;  %s71_s30 = int_to_ptr.hbm [resolvable:$true] %s70_s30 }
  0x2a   :  { %75 = dma.hbm_to_vmem [thread:$0]  %s71_s30, 16, %s73_s11, [#allocation6]  }
  0x2b   :  { %101 = dma.hbm_to_vmem [thread:$0]  %s97_s1, 16, %s99_s6, [#allocation9]  }
  0x2c   :  { %s120_s10 = sshll.u32 %s1291_s17, 4  ;;  %s1292_s24 = smov [#allocation16]   ;;  %s121_s10 = int_to_ptr.vmem [resolvable:$true] %s120_s10 }
  0x2d   :  { %123 = dma.hbm_to_vmem [thread:$0]  %s119_s14, 16, %s121_s10, [#allocation12]  }
  0x2e   :  { %s146_s5 = sshll.u32 %s1292_s24, 4  ;;  %s173_s25 = sshll.u32 %s1758_s21, 4  ;;  %s147_s5 = int_to_ptr.vmem [resolvable:$true] %s146_s5  ;;  %s174_s25 = int_to_ptr.hbm [resolvable:$true] %s173_s25 }
  0x2f   :  { %149 = dma.hbm_to_vmem [thread:$0]  %s145_s4, 16, %s147_s5, [#allocation15]  }
  0x30   :  { %s1293_s12 = smov [#allocation19]  }
  0x31   :  { %s175_s1 = sshll.u32 %s1293_s12, 4  ;;  %s176_s1 = int_to_ptr.vmem [resolvable:$true] %s175_s1 }
  0x32   :  { %181 = dma.hbm_to_vmem [thread:$0]  %s174_s25, 256, %s176_s1, [#allocation18], %s1286_s29, %s1286_s29, %s1287_s0  }
  0x33   :  { %1267 = dma.done.wait [#allocation3], 16  }
  0x34   :  { %1268 = vsyncadd [#allocation3], 4294967280 }
  0x35   :  { %1269 = dma.done.wait [#allocation6], 32  }
  0x36   :  { %1270 = vsyncadd [#allocation6], 4294967264 }
  0x37   :  { %1271 = dma.done.wait [#allocation9], 32  }
  0x38   :  { %1272 = vsyncadd [#allocation9], 4294967264 }
  0x39   :  { %1273 = dma.done.wait [#allocation12], 32  }
  0x3a   :  { %1274 = vsyncadd [#allocation12], 4294967264 }
  0x3b   :  { %1275 = dma.done.wait [#allocation15], 32  }
  0x3c   :  { %1276 = vsyncadd [#allocation15], 4294967264 }
  0x3d   :  { %1277 = dma.done.wait [#allocation18], 512  }
  0x3e   :  { %1278 = vsyncadd [#allocation18], 4294966784  ;;  %vm232_vm0 = vcmask 261120   ;;  %s1776_s26 = sld [smem:[#allocation28_spill]]  ;;  %v1294_v4 = vmov 32.0   ;;  %v394_v62 = vld [vmem:[#allocation17 + $0x8] sm:$0xff] }
  0x3f   :  { %957 = vrcp.f32 %v1294_v4  ;;  %s1777_s7 = sld [smem:[#allocation31_spill]]  ;;  %v947_v47 = vld [vmem:[#allocation2] ss:$0 sm:$0xff]  ;;  %v948_v51 = vld [vmem:[#allocation5] ss:$0 sm:$0xff]  ;;  %v393_v63 = vld [vmem:[#allocation17] sm:$0xff]  ;;  %929 = vmatpush.msra.mxu3 %v394_v62 }
  0x40   :  { %s1778_s28 = sld [smem:[#allocation33_spill]]  ;;  %v950_v61 = vld [vmem:[#allocation7] ss:$0 sm:$0xff]  ;;  %vm427_vm8 = vcmask 130048   ;;  %vm508_vm9 = vcmask 523264  }
  0x41   :  { %s1779_s2 = sld [smem:[#allocation35_spill]]  ;;  %930 = vmatpush.msra.mxu3 %v393_v63 }
  0x42   :  { %s1780_s16 = sld [smem:[#allocation32_spill]] }
  0x44   :  { %v1458_v0 = vld [vmem:[%s1776_s26] sm:$0xff]  ;;  %v1465_v2 = vld [vmem:[%s1776_s26 + $0x8] sm:$0xff] }
  0x45   :  { %v233_v1 = vsel %vm232_vm0, %v1458_v0, 0.0  ;;  %v236_v3 = vsel %vm232_vm0, %v1465_v2, 0.0  ;;  %v958_v5 = vpop.eup %957  ;;  %v297_v21 = vld [vmem:[%s1777_s7 + $0x18] sm:$0xff]  ;;  %v296_v23 = vld [vmem:[%s1777_s7 + $0x10] sm:$0xff]  ;;  %v295_v25 = vld [vmem:[%s1777_s7 + $0x8] sm:$0xff] }
  0x46   :  { %234 = vadd.xlane.f32.xlu0 %v233_v1  ;;  %v240_v6 = vmul.f32 32.0, %v958_v5  ;;  %vm244_vm1 = vweird.f32 %v958_v5  ;;  %v334_v22 = vld [vmem:[%s1778_s28 + $0x18] sm:$0xff]  ;;  %320 = vmatpush.msra.mxu0 %v297_v21  ;;  %v333_v24 = vld [vmem:[%s1778_s28 + $0x10] sm:$0xff]  ;;  %v332_v26 = vld [vmem:[%s1778_s28 + $0x8] sm:$0xff] }
  0x47   :  { %351 = vmatpush.msra.mxu1 %v334_v22  ;;  %v294_v27 = vld [vmem:[%s1777_s7] sm:$0xff]  ;;  %v365_v32 = vld [vmem:[%s1779_s2 + $0x18] sm:$0xff]  ;;  %v364_v33 = vld [vmem:[%s1779_s2 + $0x10] sm:$0xff] }
  0x48   :  { %v241_v7 = vsub.f32 1.0, %v240_v6  ;;  %321 = vmatpush.msra.mxu0 %v296_v23  ;;  %v331_v28 = vld [vmem:[%s1778_s28] sm:$0xff]  ;;  %v363_v34 = vld [vmem:[%s1779_s2 + $0x8] sm:$0xff]  ;;  %v472_v21 = vld [vmem:[%s1756_s19 + $0x18] sm:$0xff] }
  0x49   :  { %352 = vmatpush.msra.mxu1 %v333_v24  ;;  %v362_v37 = vld [vmem:[%s1779_s2] sm:$0xff]  ;;  %v471_v22 = vld [vmem:[%s1756_s19 + $0x10] sm:$0xff] }
  0x4a   :  { %v242_v8 = vmul.f32 %v958_v5, %v241_v7  ;;  %322 = vmatpush.msra.mxu0 %v295_v25 }
  0x4b   :  { %353 = vmatpush.msra.mxu1 %v332_v26  ;;  %v470_v26 = vld [vmem:[%s1756_s19 + $0x8] sm:$0xff] }
  0x4c   :  { %v243_v9 = vadd.f32 %v958_v5, %v242_v8  ;;  %323 = vmatpush.msra.mxu0 %v294_v27 }
  0x4d   :  { %354 = vmatpush.msra.mxu1 %v331_v28  ;;  %v949_v28 = vld [vmem:[%s1780_s16] ss:$0 sm:$0xff]  ;;  %s883_s16 = sshll.u32 %s1760_s23, 4  ;;  %s884_s16 = int_to_ptr.hbm [resolvable:$true] %s883_s16 }
  0x4e   :  { %237 = vadd.xlane.f32.xlu0 %v236_v3  ;;  %v1469_v10 = vsel %vm244_vm1, %v958_v5, %v243_v9  ;;  %382 = vmatpush.msrb.mxu0 %v365_v32  ;;  %v951_v9 = vld [vmem:[#allocation8] ss:$0 sm:$0xff] }
  0x4f   :  { %454 = vmatpush.msrb.mxu1 %v394_v62 }
  0x50   :  { %383 = vmatpush.msrb.mxu0 %v364_v33 }
  0x51   :  { %455 = vmatpush.msrb.mxu1 %v393_v63 }
  0x52   :  { %384 = vmatpush.msrb.mxu0 %v363_v34  ;;  %v563_v34 = vld [vmem:[%s1755_s18 + $0x8] sm:$0xff] }
  0x54   :  { %385 = vmatpush.msrb.mxu0 %v362_v37  ;;  %v528_v37 = vld [vmem:[%s1759_s22 + $0x38] sm:$0xff] }
  0xb9   :  { %v235_v11 = vpop.xlane.xlu0 %234 }
  0xba   :  { %v246_v12 = vmul.f32 %v1469_v10, %v235_v11 }
  0xbc   :  { %v248_v13 = vsub.f32 %v1458_v0, %v246_v12 }
  0xbe   :  { %v250_v14 = vmul.f32 %v248_v13, %v248_v13 }
  0xc0   :  { %v252_v15 = vsel %vm232_vm0, %v250_v14, 0.0 }
  0xc1   :  { %253 = vadd.xlane.f32.xlu1 %v252_v15  ;;  %v238_v16 = vpop.xlane.xlu0 %237 }
  0xc2   :  { %v247_v17 = vmul.f32 %v1469_v10, %v238_v16 }
  0xc4   :  { %v1476_v18 = vsub.f32 %v1465_v2, %v247_v17 }
  0xc6   :  { %v251_v19 = vmul.f32 %v1476_v18, %v1476_v18 }
  0xc8   :  { %v255_v20 = vsel %vm232_vm0, %v251_v19, 0.0 }
  0xc9   :  { %256 = vadd.xlane.f32.xlu1 %v255_v20 }
 0x134   :  { %v254_v29 = vpop.xlane.xlu1 %253 }
 0x135   :  { %v258_v30 = vmul.f32 %v254_v29, %v1469_v10  ;;  %v469_v29 = vld [vmem:[%s1756_s19] sm:$0xff] }
 0x137   :  { %v260_v31 = vadd.f32 1e-05, %v258_v30 }
 0x139   :  { %959 = vrsqrt.f32 %v260_v31  ;;  %vm268_vm3 = vweird.f32 %v260_v31 }
 0x13c   :  { %v257_v35 = vpop.xlane.xlu1 %256 }
 0x13d   :  { %v259_v36 = vmul.f32 %v257_v35, %v1469_v10  ;;  %v564_v35 = vld [vmem:[%s1755_s18 + $0x10] sm:$0xff] }
 0x13f   :  { %v960_v38 = vpop.eup %959  ;;  %v261_v39 = vadd.f32 1e-05, %v259_v36  ;;  %v565_v36 = vld [vmem:[%s1755_s18 + $0x18] sm:$0xff] }
 0x140   :  { %v263_v40 = vmul.f32 %v960_v38, %v260_v31  ;;  %vm269_vm2 = vweird.f32 %v960_v38 }
 0x141   :  { %961 = vrsqrt.f32 %v261_v39  ;;  %vm270_vm4 = vmor %vm268_vm3, %vm269_vm2  ;;  %vm278_vm6 = vweird.f32 %v261_v39 }
 0x142   :  { %v264_v41 = vmul.f32 %v960_v38, %v263_v40  ;;  %v567_v40 = vld [vmem:[%s1755_s18 + $0x28] sm:$0xff] }
 0x144   :  { %v265_v42 = vmul.f32 0.5, %v264_v41  ;;  %v477_v41 = vld [vmem:[#allocation19] sm:$0xff] }
 0x146   :  { %v266_v43 = vsub.f32 1.5, %v265_v42 }
 0x147   :  { %v962_v44 = vpop.eup %961 }
 0x148   :  { %v267_v45 = vmul.f32 %v960_v38, %v266_v43  ;;  %v273_v46 = vmul.f32 %v962_v44, %v261_v39  ;;  %vm279_vm5 = vweird.f32 %v962_v44  ;;  %v566_v39 = vld [vmem:[%s1755_s18 + $0x20] sm:$0xff] }
 0x149   :  { %vm280_vm7 = vmor %vm278_vm6, %vm279_vm5 }
 0x14a   :  { %v271_v48 = vsel %vm270_vm4, %v960_v38, %v267_v45  ;;  %v274_v49 = vmul.f32 %v962_v44, %v273_v46  ;;  %v527_v38 = vld [vmem:[%s1759_s22 + $0x30] sm:$0xff] }
 0x14b   :  { %v282_v50 = vmul.f32 %v271_v48, %v248_v13  ;;  %v568_v45 = vld [vmem:[%s1755_s18 + $0x30] sm:$0xff] }
 0x14c   :  { %v275_v52 = vmul.f32 0.5, %v274_v49  ;;  %v478_v46 = vld [vmem:[#allocation19 + $0x8] sm:$0xff] }
 0x14d   :  { %v287_v53 = vmul.f32 %v947_v47, %v282_v50  ;;  %v569_v50 = vld [vmem:[%s1755_s18 + $0x38] sm:$0xff] }
 0x14e   :  { %v276_v54 = vsub.f32 1.5, %v275_v52  ;;  %v525_v52 = vld [vmem:[%s1759_s22 + $0x20] sm:$0xff] }
 0x14f   :  { %v292_v55 = vadd.f32 %v948_v51, %v287_v53 }
 0x150   :  { %v277_v56 = vmul.f32 %v962_v44, %v276_v54  ;;  %v524_v54 = vld [vmem:[%s1759_s22 + $0x18] sm:$0xff] }
 0x151   :  { %901 = vmatmul.msk.f32.vlgmr.msra.gmra.mxu0 %vm232_vm0, %v292_v55  ;;  %903 = vmatmul.msk.f32.vlgmr.msra.gmra.mxu1 %vm232_vm0, %v292_v55 }
 0x152   :  { %v281_v57 = vsel %vm280_vm7, %v962_v44, %v277_v56  ;;  %543 = vmatpush.msra.mxu1 %v528_v37  ;;  %v522_v56 = vld [vmem:[%s1759_s22 + $0x8] sm:$0xff]  ;;  %v680_v37 = vld [vmem:[%s1746_s9] sm:$0xff] }
 0x153   :  { %v283_v58 = vmul.f32 %v281_v57, %v1476_v18  ;;  %v562_v18 = vld [vmem:[%s1755_s18] sm:$0xff] }
 0x154   :  { %544 = vmatpush.msra.mxu1 %v527_v38  ;;  %v521_v57 = vld [vmem:[%s1759_s22] sm:$0xff] }
 0x155   :  { %v288_v59 = vmul.f32 %v947_v47, %v283_v58 }
 0x157   :  { %v293_v60 = vadd.f32 %v948_v51, %v288_v59  ;;  %v526_v51 = vld [vmem:[%s1759_s22 + $0x28] sm:$0xff] }
 0x158   :  { %545 = vmatpush.msra.mxu1 %v526_v51 }
 0x159   :  { %902 = vmatmul.msk.f32.gmra.mxu0 %vm232_vm0, %v293_v60  ;;  %904 = vmatmul.msk.f32.gmra.mxu1 %vm232_vm0, %v293_v60 }
 0x15a   :  { %546 = vmatpush.msra.mxu1 %v525_v52 }
 0x15c   :  { %547 = vmatpush.msra.mxu1 %v524_v54 }
 0x161   :  { %905 = vmatmul.msk.f32.vlgmr.msrb.gmra.mxu0 %vm232_vm0, %v292_v55  ;;  %v523_v55 = vld [vmem:[%s1759_s22 + $0x10] sm:$0xff] }
 0x162   :  { %548 = vmatpush.msra.mxu1 %v523_v55 }
 0x164   :  { %549 = vmatpush.msra.mxu1 %v522_v56 }
 0x166   :  { %550 = vmatpush.msra.mxu1 %v521_v57  ;;  %v778_v57 = vld [vmem:[%s1750_s13 + $0x18] sm:$0xff] }
 0x169   :  { %906 = vmatmul.msk.f32.gmra.mxu0 %vm232_vm0, %v293_v60 }
 0x1ce   :  { %v325_v1 = vpop.f32.mrf.mxu0  ;;  %v356_v3 = vpop.f32.mrf.mxu1 }
 0x1cf   :  { %v357_v4 = vadd.f32 %v950_v61, %v356_v3  ;;  %v326_v32 = vadd.f32 %v949_v28, %v325_v1 }
 0x1d1   :  { %395 = vxpose.xlu2.b32.start [1/2] (short) (narrow) %v357_v4, 32 }
 0x1d6   :  { %v328_v5 = vpop.f32.mrf.mxu0  ;;  %v359_v6 = vpop.f32.mrf.mxu1 }
 0x1d7   :  { %v360_v7 = vadd.f32 %v950_v61, %v359_v6  ;;  %v329_v33 = vadd.f32 %v949_v28, %v328_v5  ;;  %v683_v28 = vld [vmem:[%s1746_s9 + $0x18] sm:$0xff] }
 0x1d9   :  { %396 = vxpose.xlu2.b32.end [2/2] (short) (narrow) %v360_v7, 32 }
 0x1de   :  { %v387_v8 = vpop.f32.mrf.mxu0 }
 0x1df   :  { %v388_v13 = vadd.f32 %v951_v9, %v387_v8 }
 0x1e6   :  { %v390_v11 = vpop.f32.mrf.mxu0 }
 0x1e7   :  { %v391_v12 = vadd.f32 %v951_v9, %v390_v11  ;;  %v641_v11 = vld [vmem:[%s1757_s20 + $0x30] sm:$0xff] }
 0x1e9   :  { %608 = vmatpush.msra.mxu2 %v391_v12  ;;  %v642_v12 = vld [vmem:[%s1757_s20 + $0x38] sm:$0xff] }
 0x1eb   :  { %609 = vmatpush.msra.mxu2 %v388_v13  ;;  %v640_v13 = vld [vmem:[%s1757_s20 + $0x28] sm:$0xff] }
 0x1ec   :  { %915 = vmatmul.msk.f32.vlgmr.msra.gmra.mxu2 %vm427_vm8, %v562_v18 }
 0x1f4   :  { %916 = vmatmul.msk.f32.gmra.mxu2 %vm427_vm8, %v563_v34 }
 0x1fc   :  { %917 = vmatmul.msk.f32.gmra.mxu2 %vm427_vm8, %v564_v35 }
 0x204   :  { %918 = vmatmul.msk.f32.gmra.mxu2 %vm427_vm8, %v565_v36 }
 0x20c   :  { %919 = vmatmul.msk.f32.gmra.mxu2 %vm427_vm8, %v566_v39 }
 0x214   :  { %920 = vmatmul.msk.f32.gmra.mxu2 %vm427_vm8, %v567_v40  ;;  %v952_v40 = vld [vmem:[#allocation10] ss:$0 sm:$0xff] }
 0x21c   :  { %921 = vmatmul.msk.f32.gmra.mxu2 %vm427_vm8, %v568_v45 }
 0x224   :  { %922 = vmatmul.msk.f32.gmra.mxu2 %vm427_vm8, %v569_v50 }
 0x26a   :  { %v411_v14 = vpop.trf.xlu2 }
 0x26b   :  { %907 = vmatmul.msk.f32.vlgmr.msrb.gmra.mxu1 %vm427_vm8, %v411_v14 }
 0x26c   :  { %801 = vmatpush.msrb.mxu1 %v778_v57 }
 0x26f   :  { %v611_v53 = vpop.f32.mrf.mxu2 }
 0x272   :  { %v412_v15 = vpop.trf.xlu2 }
 0x273   :  { %908 = vmatmul.msk.f32.gmra.mxu1 %vm427_vm8, %v412_v15 }
 0x277   :  { %v614_v58 = vpop.f32.mrf.mxu2 }
 0x27a   :  { %v413_v16 = vpop.trf.xlu2 }
 0x27b   :  { %909 = vmatmul.msk.f32.vlgmr.msra.gmra.mxu3 %vm427_vm8, %v413_v16 }
 0x27f   :  { %v617_v59 = vpop.f32.mrf.mxu2 }
 0x282   :  { %v414_v17 = vpop.trf.xlu2 }
 0x283   :  { %910 = vmatmul.msk.f32.gmra.mxu3 %vm427_vm8, %v414_v17  ;;  %v639_v17 = vld [vmem:[%s1757_s20 + $0x20] sm:$0xff] }
 0x287   :  { %v620_v60 = vpop.f32.mrf.mxu2 }
 0x28f   :  { %v623_v1 = vpop.f32.mrf.mxu2 }
 0x297   :  { %v626_v7 = vpop.f32.mrf.mxu2 }
 0x298   :  { %v648_v18 = vmul.f32 %v640_v13, %v626_v7  ;;  %v842_v7 = vld [vmem:[%s1752_s15 + $0x60] sm:$0xff] }
 0x29f   :  { %v629_v9 = vpop.f32.mrf.mxu2 }
 0x2a0   :  { %v649_v15 = vmul.f32 %v641_v11, %v629_v9 }
 0x2a7   :  { %v632_v14 = vpop.f32.mrf.mxu2 }
 0x2a8   :  { %v650_v16 = vmul.f32 %v642_v12, %v632_v14 }
 0x2aa   :  { %665 = vmatpush.msrb.mxu3 %v650_v16 }
 0x2ac   :  { %666 = vmatpush.msrb.mxu3 %v649_v15 }
 0x2ae   :  { %667 = vmatpush.msrb.mxu3 %v648_v18  ;;  %v953_v18 = vld [vmem:[#allocation11] ss:$0 sm:$0xff] }
 0x2e8   :  { %v457_v19 = vpop.f32.mrf.mxu1 }
 0x2e9   :  { %v473_v31 = vmul.f32 %v469_v29, %v457_v19  ;;  %v638_v19 = vld [vmem:[%s1757_s20 + $0x18] sm:$0xff]  ;;  %v682_v29 = vld [vmem:[%s1746_s9 + $0x10] sm:$0xff] }
 0x2f0   :  { %v460_v25 = vpop.f32.mrf.mxu1 }
 0x2f1   :  { %v474_v30 = vmul.f32 %v470_v26, %v460_v25  ;;  %v635_v25 = vld [vmem:[%s1757_s20] sm:$0xff] }
 0x2fe   :  { %v463_v20 = vpop.f32.mrf.mxu3 }
 0x2ff   :  { %v475_v27 = vmul.f32 %v471_v22, %v463_v20  ;;  %v647_v20 = vmul.f32 %v639_v17, %v623_v1  ;;  %v646_v22 = vmul.f32 %v638_v19, %v620_v60  ;;  %v775_v60 = vld [vmem:[%s1750_s13] sm:$0xff]  ;;  %v845_v1 = vld [vmem:[%s1752_s15 + $0x78] sm:$0xff] }
 0x301   :  { %668 = vmatpush.msrb.mxu3 %v647_v20 }
 0x303   :  { %669 = vmatpush.msrb.mxu3 %v646_v22 }
 0x306   :  { %v466_v23 = vpop.f32.mrf.mxu3 }
 0x307   :  { %v476_v24 = vmul.f32 %v472_v21, %v466_v23  ;;  %v637_v21 = vld [vmem:[%s1757_s20 + $0x10] sm:$0xff]  ;;  %v636_v23 = vld [vmem:[%s1757_s20 + $0x8] sm:$0xff] }
 0x308   :  { %v644_v26 = vmul.f32 %v636_v23, %v614_v58  ;;  %v777_v58 = vld [vmem:[%s1750_s13 + $0x10] sm:$0xff] }
 0x309   :  { %497 = vmatpush.msra.mxu0 %v476_v24  ;;  %v645_v24 = vmul.f32 %v637_v21, %v617_v59  ;;  %802 = vmatpush.msrb.mxu1 %v777_v58  ;;  %v776_v59 = vld [vmem:[%s1750_s13 + $0x8] sm:$0xff] }
 0x30a   :  { %v954_v21 = vld [vmem:[#allocation13] ss:$0 sm:$0xff] }
 0x30b   :  { %498 = vmatpush.msra.mxu0 %v475_v27  ;;  %v643_v27 = vmul.f32 %v635_v25, %v611_v53  ;;  %670 = vmatpush.msrb.mxu3 %v645_v24 }
 0x30c   :  { %803 = vmatpush.msrb.mxu1 %v776_v59 }
 0x30d   :  { %499 = vmatpush.msra.mxu0 %v474_v30  ;;  %671 = vmatpush.msrb.mxu3 %v644_v26  ;;  %v681_v30 = vld [vmem:[%s1746_s9 + $0x8] sm:$0xff] }
 0x30e   :  { %804 = vmatpush.msrb.mxu1 %v775_v60 }
 0x30f   :  { %500 = vmatpush.msra.mxu0 %v473_v31  ;;  %672 = vmatpush.msrb.mxu3 %v643_v27 }
 0x310   :  { %911 = vmatmul.msk.f32.vlgmr.msra.gmra.mxu0 %vm232_vm0, %v326_v32 }
 0x311   :  { %706 = vmatpush.msrb.mxu0 %v683_v28  ;;  %850 = vmatpush.msra.mxu3 %v845_v1 }
 0x313   :  { %707 = vmatpush.msrb.mxu0 %v682_v29 }
 0x315   :  { %708 = vmatpush.msrb.mxu0 %v681_v30 }
 0x317   :  { %709 = vmatpush.msrb.mxu0 %v680_v37  ;;  %v835_v37 = vld [vmem:[%s1752_s15 + $0x28] sm:$0xff] }
 0x318   :  { %912 = vmatmul.msk.f32.gmra.mxu0 %vm232_vm0, %v329_v33 }
 0x38d   :  { %v502_v42 = vpop.f32.mrf.mxu0 }
 0x38e   :  { %v503_v43 = vadd.f32 %v502_v42, %v477_v41 }
 0x390   :  { %v509_v44 = vsel %vm508_vm9, %v503_v43, -inf }
 0x391   :  { %510 = vmax.xlane.f32.xlu0 %v509_v44 }
 0x395   :  { %v505_v47 = vpop.f32.mrf.mxu0 }
 0x396   :  { %v506_v48 = vadd.f32 %v505_v47, %v478_v46 }
 0x398   :  { %v512_v49 = vsel %vm508_vm9, %v506_v48, -inf }
 0x399   :  { %513 = vmax.xlane.f32.xlu1 %v512_v49 }
 0x404   :  { %v511_v61 = vpop.xlane.xlu0 %510 }
 0x405   :  { %v515_v62 = vsub.f32 %v503_v43, %v511_v61 }
 0x407   :  { %v517_v63 = vmul.f32 1.442695, %v515_v62 }
 0x409   :  { %963 = vpow2.f32 %v517_v63 }
 0x40c   :  { %v514_v3 = vpop.xlane.xlu1 %513 }
 0x40d   :  { %v516_v4 = vsub.f32 %v506_v48, %v514_v3  ;;  %v844_v3 = vld [vmem:[%s1752_s15 + $0x70] sm:$0xff] }
 0x40e   :  { %851 = vmatpush.msra.mxu3 %v844_v3 }
 0x40f   :  { %v964_v5 = vpop.eup %963  ;;  %v519_v6 = vmul.f32 1.442695, %v516_v4  ;;  %v843_v4 = vld [vmem:[%s1752_s15 + $0x68] sm:$0xff] }
 0x410   :  { %913 = vmatmul.msk.f32.vlgmr.msra.gmra.mxu1 %vm508_vm9, %v964_v5  ;;  %852 = vmatpush.msra.mxu3 %v843_v4  ;;  %v956_v4 = vld [vmem:[#allocation16] ss:$0 sm:$0xff] }
 0x411   :  { %965 = vpow2.f32 %v519_v6 }
 0x412   :  { %853 = vmatpush.msra.mxu3 %v842_v7 }
 0x417   :  { %v966_v8 = vpop.eup %965 }
 0x418   :  { %914 = vmatmul.msk.f32.gmra.mxu1 %vm508_vm9, %v966_v8 }
 0x48d   :  { %v552_v31 = vpop.f32.mrf.mxu1 }
 0x48e   :  { %967 = vrcp.f32 %v552_v31  ;;  %v841_v31 = vld [vmem:[%s1752_s15 + $0x58] sm:$0xff] }
 0x48f   :  { %854 = vmatpush.msra.mxu3 %v841_v31 }
 0x494   :  { %v968_v32 = vpop.eup %967 }
 0x495   :  { %v555_v33 = vpop.f32.mrf.mxu1  ;;  %v560_v34 = vmul.f32 %v968_v32, %v964_v5  ;;  %v840_v32 = vld [vmem:[%s1752_s15 + $0x50] sm:$0xff] }
 0x496   :  { %969 = vrcp.f32 %v555_v33  ;;  %855 = vmatpush.msra.mxu3 %v840_v32  ;;  %v839_v33 = vld [vmem:[%s1752_s15 + $0x48] sm:$0xff] }
 0x497   :  { %923 = vmatmul.msk.f32.vlgmr.msrb.gmra.mxu3 %vm508_vm9, %v560_v34  ;;  %v838_v34 = vld [vmem:[%s1752_s15 + $0x40] sm:$0xff] }
 0x498   :  { %856 = vmatpush.msra.mxu3 %v839_v33 }
 0x49a   :  { %857 = vmatpush.msra.mxu3 %v838_v34 }
 0x49c   :  { %v970_v35 = vpop.eup %969 }
 0x49d   :  { %v561_v36 = vmul.f32 %v970_v35, %v966_v8  ;;  %v837_v35 = vld [vmem:[%s1752_s15 + $0x38] sm:$0xff] }
 0x49e   :  { %858 = vmatpush.msra.mxu3 %v837_v35 }
 0x49f   :  { %924 = vmatmul.msk.f32.gmra.mxu3 %vm508_vm9, %v561_v36  ;;  %v836_v36 = vld [vmem:[%s1752_s15 + $0x30] sm:$0xff] }
 0x4a0   :  { %859 = vmatpush.msra.mxu3 %v836_v36 }
 0x4a2   :  { %860 = vmatpush.msra.mxu3 %v835_v37 }
 0x51a   :  { %v674_v38 = vpop.f32.mrf.mxu3 }
 0x51b   :  { %925 = vmatmul.msk.f32.vlgmr.msrb.gmra.mxu0 %vm232_vm0, %v674_v38  ;;  %v834_v38 = vld [vmem:[%s1752_s15 + $0x20] sm:$0xff] }
 0x51c   :  { %861 = vmatpush.msra.mxu3 %v834_v38 }
 0x522   :  { %v677_v39 = vpop.f32.mrf.mxu3 }
 0x523   :  { %926 = vmatmul.msk.f32.gmra.mxu0 %vm232_vm0, %v677_v39  ;;  %v833_v39 = vld [vmem:[%s1752_s15 + $0x18] sm:$0xff] }
 0x524   :  { %862 = vmatpush.msra.mxu3 %v833_v39 }
 0x598   :  { %v711_v41 = vpop.f32.mrf.mxu0 }
 0x599   :  { %v712_v42 = vadd.f32 %v952_v40, %v711_v41  ;;  %v831_v41 = vld [vmem:[%s1752_s15 + $0x8] sm:$0xff] }
 0x59b   :  { %v1648_v43 = vadd.f32 %v712_v42, %v1458_v0  ;;  %v830_v42 = vld [vmem:[%s1752_s15] sm:$0xff] }
 0x59d   :  { %v721_v44 = vsel %vm232_vm0, %v1648_v43, 0.0 }
 0x59e   :  { %722 = vadd.xlane.f32.xlu2 %v721_v44  ;;  %v955_v44 = vld [vmem:[#allocation14] ss:$0 sm:$0xff] }
 0x5a0   :  { %v714_v45 = vpop.f32.mrf.mxu0 }
 0x5a1   :  { %v715_v46 = vadd.f32 %v952_v40, %v714_v45  ;;  %v832_v40 = vld [vmem:[%s1752_s15 + $0x10] sm:$0xff]  ;;  %s1295_s15 = smov [#allocation20]  }
 0x5a2   :  { %863 = vmatpush.msra.mxu3 %v832_v40  ;;  %s881_s12 = sshll.u32 %s1295_s15, 4  ;;  %s882_s12 = int_to_ptr.vmem [resolvable:$true] %s881_s12 }
 0x5a3   :  { %v1653_v47 = vadd.f32 %v715_v46, %v1465_v2 }
 0x5a4   :  { %864 = vmatpush.msra.mxu3 %v831_v41 }
 0x5a5   :  { %v724_v48 = vsel %vm232_vm0, %v1653_v47, 0.0 }
 0x5a6   :  { %725 = vadd.xlane.f32.xlu0 %v724_v48  ;;  %865 = vmatpush.msra.mxu3 %v830_v42 }
 0x611   :  { %v723_v49 = vpop.xlane.xlu2 %722 }
 0x612   :  { %v727_v50 = vmul.f32 %v723_v49, %v1469_v10 }
 0x614   :  { %v729_v51 = vsub.f32 %v1648_v43, %v727_v50 }
 0x616   :  { %v731_v0 = vmul.f32 %v729_v51, %v729_v51 }
 0x618   :  { %v733_v52 = vsel %vm232_vm0, %v731_v0, 0.0 }
 0x619   :  { %734 = vadd.xlane.f32.xlu1 %v733_v52  ;;  %v726_v53 = vpop.xlane.xlu0 %725 }
 0x61a   :  { %v728_v54 = vmul.f32 %v726_v53, %v1469_v10 }
 0x61c   :  { %v730_v55 = vsub.f32 %v1653_v47, %v728_v54 }
 0x61e   :  { %v732_v2 = vmul.f32 %v730_v55, %v730_v55 }
 0x620   :  { %v736_v56 = vsel %vm232_vm0, %v732_v2, 0.0 }
 0x621   :  { %737 = vadd.xlane.f32.xlu0 %v736_v56 }
 0x68c   :  { %v735_v61 = vpop.xlane.xlu1 %734 }
 0x68d   :  { %v739_v62 = vmul.f32 %v735_v61, %v1469_v10 }
 0x68f   :  { %v741_v63 = vadd.f32 1e-05, %v739_v62 }
 0x691   :  { %971 = vrsqrt.f32 %v741_v63  ;;  %vm749_vm11 = vweird.f32 %v741_v63 }
 0x694   :  { %v738_v5 = vpop.xlane.xlu0 %737 }
 0x695   :  { %v740_v6 = vmul.f32 %v738_v5, %v1469_v10 }
 0x697   :  { %v972_v8 = vpop.eup %971  ;;  %v742_v9 = vadd.f32 1e-05, %v740_v6 }
 0x698   :  { %v744_v11 = vmul.f32 %v972_v8, %v741_v63  ;;  %vm750_vm10 = vweird.f32 %v972_v8 }
 0x699   :  { %973 = vrsqrt.f32 %v742_v9  ;;  %vm751_vm12 = vmor %vm749_vm11, %vm750_vm10  ;;  %vm759_vm14 = vweird.f32 %v742_v9 }
 0x69a   :  { %v745_v12 = vmul.f32 %v972_v8, %v744_v11 }
 0x69c   :  { %v746_v13 = vmul.f32 0.5, %v745_v12 }
 0x69e   :  { %v747_v14 = vsub.f32 1.5, %v746_v13 }
 0x69f   :  { %v974_v15 = vpop.eup %973 }
 0x6a0   :  { %v748_v16 = vmul.f32 %v972_v8, %v747_v14  ;;  %v754_v17 = vmul.f32 %v974_v15, %v742_v9  ;;  %vm760_vm13 = vweird.f32 %v974_v15 }
 0x6a1   :  { %vm761_vm15 = vmor %vm759_vm14, %vm760_vm13 }
 0x6a2   :  { %v752_v10 = vsel %vm751_vm12, %v972_v8, %v748_v16  ;;  %v755_v19 = vmul.f32 %v974_v15, %v754_v17 }
 0x6a3   :  { %v763_v20 = vmul.f32 %v752_v10, %v729_v51 }
 0x6a4   :  { %v756_v22 = vmul.f32 0.5, %v755_v19 }
 0x6a5   :  { %v768_v23 = vmul.f32 %v953_v18, %v763_v20 }
 0x6a6   :  { %v757_v24 = vsub.f32 1.5, %v756_v22 }
 0x6a7   :  { %v773_v25 = vadd.f32 %v954_v21, %v768_v23 }
 0x6a8   :  { %v758_v26 = vmul.f32 %v974_v15, %v757_v24 }
 0x6a9   :  { %927 = vmatmul.msk.f32.vlgmr.msrb.gmra.mxu1 %vm232_vm0, %v773_v25 }
 0x6aa   :  { %v762_v27 = vsel %vm761_vm15, %v974_v15, %v758_v26 }
 0x6ab   :  { %v764_v28 = vmul.f32 %v762_v27, %v730_v55 }
 0x6ad   :  { %v769_v29 = vmul.f32 %v953_v18, %v764_v28 }
 0x6af   :  { %v774_v30 = vadd.f32 %v954_v21, %v769_v29 }
 0x6b1   :  { %928 = vmatmul.msk.f32.gmra.mxu1 %vm232_vm0, %v774_v30 }
 0x726   :  { %v806_v45 = vpop.f32.mrf.mxu1 }
 0x727   :  { %v807_v46 = vadd.f32 %v955_v44, %v806_v45 }
 0x729   :  { %v814_v48 = vmul.f32 0.044715, %v807_v46  ;;  %v812_v59 = vmul.f32 0.5, %v807_v46 }
 0x72b   :  { %v816_v49 = vmul.f32 %v814_v48, %v807_v46 }
 0x72d   :  { %v818_v50 = vmul.f32 %v816_v49, %v807_v46 }
 0x72e   :  { %v809_v51 = vpop.f32.mrf.mxu1 }
 0x72f   :  { %v810_v0 = vadd.f32 %v955_v44, %v809_v51  ;;  %v820_v52 = vadd.f32 %v818_v50, %v807_v46 }
 0x731   :  { %v822_v53 = vmul.f32 0.7978846, %v820_v52  ;;  %v815_v54 = vmul.f32 0.044715, %v810_v0  ;;  %v813_v63 = vmul.f32 0.5, %v810_v0 }
 0x733   :  { %975 = vtanh.f32 %v822_v53  ;;  %v817_v55 = vmul.f32 %v815_v54, %v810_v0 }
 0x735   :  { %v819_v2 = vmul.f32 %v817_v55, %v810_v0 }
 0x737   :  { %v821_v56 = vadd.f32 %v819_v2, %v810_v0 }
 0x739   :  { %v976_v57 = vpop.eup %975  ;;  %v823_v58 = vmul.f32 0.7978846, %v821_v56 }
 0x73a   :  { %v826_v60 = vadd.f32 1.0, %v976_v57 }
 0x73b   :  { %977 = vtanh.f32 %v823_v58 }
 0x73c   :  { %v828_v61 = vmul.f32 %v826_v60, %v812_v59 }
 0x73e   :  { %866 = vmatmul.f32.vlgmr.msra.gmra.mxu3 %v828_v61 }
 0x741   :  { %v978_v62 = vpop.eup %977 }
 0x742   :  { %v827_v1 = vadd.f32 1.0, %v978_v62 }
 0x744   :  { %v829_v3 = vmul.f32 %v827_v1, %v813_v63 }
 0x746   :  { %869 = vmatmul.f32.gmra.mxu3 %v829_v3 }
 0x7c1   :  { %v867_v5 = vpop.f32.mrf.mxu3 }
 0x7c2   :  { %v868_v6 = vadd.f32 %v956_v4, %v867_v5 }
 0x7c4   :  { %v873_v7 = vadd.f32 %v868_v6, %v1648_v43 }
 0x7c6   :  { %875 = vst.msk [vmem:[#allocation20] sm:$0xff] %vm232_vm0, %v873_v7 }
 0x7c9   :  { %v870_v8 = vpop.f32.mrf.mxu3 }
 0x7ca   :  { %v871_v9 = vadd.f32 %v956_v4, %v870_v8 }
 0x7cc   :  { %v874_v11 = vadd.f32 %v871_v9, %v1653_v47 }
 0x7ce   :  { %876 = vst.msk [vmem:[#allocation20 + $0x8] sm:$0xff] %vm232_vm0, %v874_v11 }
 0x7cf   :  { %889 = dma.vmem_to_hbm [thread:$0]  %s882_s12, 256, %s884_s16, [#allocation4], %s1286_s29, %s1286_s29, %s1287_s0  }
 0x7d0   :  { %1279 = dma.done.wait [#allocation4], 256  }
 0x7d1   :  { %1280 = vsyncadd [#allocation4], 4294967040 }
 0x7d2   :  { %894 = vsyncpa [#allocation3], 1 }
 0x7d3   :  { %895 = vsyncpa [#allocation6], 1 }
 0x7d4   :  { %896 = vsyncpa [#allocation9], 1 }
 0x7d5   :  { %897 = vsyncpa [#allocation12], 1 }
 0x7d6   :  { %898 = vsyncpa [#allocation15], 1 }
 0x7d7   :  { %899 = vsyncpa [#allocation18], 1 }
 0x7d8   :  { %900 = vsyncpa [#allocation4], 1 }

</bundles_post_ra>
